<compile_context>
chip_gen: v7x
topology: tpu7x:2x2x1
jax: 0.10.0
libtpu: 0.0.40
codegen_flags: <defaults>
</compile_context>

<pallas_src>
import functools

import jax
import jax.numpy as jnp
from jax.experimental import pallas as pl
from jax.experimental.pallas import tpu as pltpu


def _round_up(a, m):
    return -(-a // m) * m


def _largest_divisor(size, upper, align):
    """Largest multiple of `align` that is <= upper and divides `size`."""
    upper = (min(upper, size) // align) * align
    for cand in range(upper, align - 1, -align):
        if size % cand == 0:
            return cand
    return None


def _choose_tile(dim, target, align):
    """Pick (tile, padded_dim): tile is a multiple of `align`, divides padded_dim."""
    dim_a = _round_up(dim, align)
    target = max(align, (target // align) * align)
    if dim_a <= target:
        return dim_a, dim_a
    best = _largest_divisor(dim_a, target, align)
    if best is not None and best >= target // 2:
        return best, dim_a
    # No good divisor: pad up (wastes < target elements) rather than use tiny tiles.
    return target, _round_up(dim_a, target)


def _linear_kernel(x_ref, w_ref, b_ref, o_ref, *, tk):
    # x_ref: (tm, Dp) resident row-panel   w_ref: (tk, tn) K-streamed
    # b_ref: (1, tn)                       o_ref: (tm, tn) f32 (acts as accumulator)
    k = pl.program_id(2)

    @pl.when(k == 0)
    def _():
        # Fold the bias into the accumulator init -> no epilogue add.
        o_ref[...] = jnp.broadcast_to(b_ref[...].astype(jnp.float32), o_ref.shape)

    off = pl.multiple_of(k * tk, 128)
    x_chunk = x_ref[:, pl.ds(off, tk)]
    o_ref[...] += jnp.dot(x_chunk, w_ref[...], preferred_element_type=jnp.float32)


def make_linear(W, b, *, tm=512, tn=512, tk=512, use_bf16=True,
                vmem_budget_bytes=48 * 1024 * 1024):
    """Build a jitted forward(x) equivalent to torch.addmm(b, x.view(-1,D), W.t()).

    W: (H, D), b: (H,). Parameter transpose / padding / cast happens ONCE here,
    not per forward call.
    """
    H, D = W.shape
    compute_dtype = jnp.bfloat16 if use_bf16 else jnp.float32
    in_bytes = jnp.dtype(compute_dtype).itemsize

    tn_, Hp = _choose_tile(H, tn, 128)
    tk_, Dp = _choose_tile(D, tk, 128)

    # Pre-transposed, padded, cast weight (Dp, Hp) and padded f32 bias (1, Hp).
    w_p = jnp.zeros((Dp, Hp), compute_dtype).at[:D, :H].set(W.T.astype(compute_dtype))
    b_p = jnp.zeros((1, Hp), jnp.float32).at[0, :H].set(b.astype(jnp.float32))

    kernel = functools.partial(_linear_kernel, tk=tk_)

    @jax.jit
    def forward(x):
        B_, T_, D_ = x.shape
        assert D_ == D, "input feature dim mismatch"
        M = B_ * T_

        tm_local, Mp = _choose_tile(M, tm, 8)

        # Shrink tm if the resident x panel (double-buffered) would blow the budget.
        def vmem_est(t):
            return (2 * t * Dp * in_bytes        # x panel
                    + 2 * tk_ * tn_ * in_bytes   # W tiles
                    + 2 * t * tn_ * 4            # output tiles (f32)
                    + 2 * tn_ * 4)               # bias
        budget = int(vmem_budget_bytes * 0.8)
        while vmem_est(tm_local) > budget and tm_local > 8:
            nxt = _largest_divisor(Mp, tm_local // 2, 8)
            if nxt is None or nxt >= tm_local:
                break
            tm_local = nxt

        # v7x has 2 TensorCores: ensure >= 2 steps along the 'parallel' axes.
        if (Mp // tm_local) * (Hp // tn_) < 2:
            nxt = _largest_divisor(Mp, tm_local // 2, 8)
            if nxt is not None:
                tm_local = nxt

        # Pad / cast x (zero padding on K rows contributes nothing).
        x_flat = x.reshape(M, D).astype(compute_dtype)
        x_p = x_flat
        if (Mp, Dp) != (M, D):
            x_p = jnp.zeros((Mp, Dp), compute_dtype).at[:M, :D].set(x_flat)

        grid = (Mp // tm_local, Hp // tn_, Dp // tk_)

        cost = pl.CostEstimate(
            flops=2 * Mp * Dp * Hp,
            transcendentals=0,
            bytes_accessed=(Mp * Dp + Dp * Hp + Hp) * in_bytes + Mp * Hp * 4,
        )

        out = pl.pallas_call(
            kernel,
            out_shape=jax.ShapeDtypeStruct((Mp, Hp), jnp.float32),
            grid_spec=pltpu.PrefetchScalarGridSpec(
                num_scalar_prefetch=0,
                grid=grid,
                in_specs=[
                    # x row-panel: constant across j,k -> stays resident in VMEM.
                    pl.BlockSpec((tm_local, Dp), lambda i, j, k: (i, 0)),
                    # W^T tile: streamed along K.
                    pl.BlockSpec((tk_, tn_), lambda i, j, k: (k, j)),
                    # bias tile: constant across i,k.
                    pl.BlockSpec((1, tn_), lambda i, j, k: (0, j)),
                ],
                out_specs=pl.BlockSpec((tm_local, tn_), lambda i, j, k: (i, j)),
            ),
            compiler_params=pltpu.CompilerParams(
                dimension_semantics=("parallel", "parallel", "arbitrary"),
                vmem_limit_bytes=vmem_budget_bytes,
            ),
            cost_estimate=cost,
        )(x_p, w_p, b_p)

        return out[:M, :H]

    return forward


if __name__ == "__main__":
    key = jax.random.PRNGKey(0)
    k_x, k_w, k_b = jax.random.split(key, 3)

    B, T = 2, 8          # leading dims (flattened by forward)
    input_size = 32      # D
    hidden_size = 64     # H

    x = jax.random.normal(k_x, (B, T, input_size), dtype=jnp.float32)
    W = jax.random.normal(k_w, (hidden_size, input_size), dtype=jnp.float32) * 0.1
    b = jax.random.normal(k_b, (hidden_size,), dtype=jnp.float32) * 0.1

    ref = x.reshape(-1, input_size) @ W.T + b

    # Fast path: bf16 operands, f32 accumulation (default).
    fwd_bf16 = make_linear(W, b, use_bf16=True)
    z = fwd_bf16(x)
    jax.block_until_ready(z)
    assert z.shape == (B * T, hidden_size)
    assert z.dtype == jnp.float32
    assert jnp.allclose(z, ref, atol=3e-2, rtol=3e-2), float(jnp.max(jnp.abs(z - ref)))

    # Exact-parity path: f32 operands (matches torch f32 addmm to tight tolerance).
    fwd_f32 = make_linear(W, b, use_bf16=False)
    z32 = fwd_f32(x)
    jax.block_until_ready(z32)
    assert jnp.allclose(z32, ref, atol=1e-5, rtol=1e-5)

    print("KERNEL_OK")
</pallas_src>

<mosaic_0001>
module attributes {stable_mosaic.version = 11 : i64} {
  func.func @_linear_kernel(%arg0: i32, %arg1: i32, %arg2: i32, %arg3: memref<8x128xbf16, #tpu.memory_space<vmem>>, %arg4: memref<128x128xbf16, #tpu.memory_space<vmem>>, %arg5: memref<1x128xf32, #tpu.memory_space<vmem>>, %arg6: memref<8x128xf32, #tpu.memory_space<vmem>>) attributes {dimension_semantics = [#tpu.dimension_semantics<parallel>, #tpu.dimension_semantics<parallel>, #tpu.dimension_semantics<arbitrary>], iteration_bounds = array<i64: 2, 1, 1>, scalar_prefetch = 0 : i64, scratch_operands = 0 : i64, tpu.core_type = #tpu.core_type<tc>, window_params = [{transform_indices = @transform_0, window_bounds = array<i64: 8, 128>}, {transform_indices = @transform_1, window_bounds = array<i64: 128, 128>}, {transform_indices = @transform_2, window_bounds = array<i64: 1, 128>}, {transform_indices = @transform_3, window_bounds = array<i64: 8, 128>}]} {
    %c0_i32 = arith.constant 0 : i32
    %0 = arith.cmpi eq, %arg2, %c0_i32 : i32
    %1 = arith.extui %0 : i1 to i32
    %c0_i32_0 = arith.constant 0 : i32
    %2 = arith.cmpi ne, %1, %c0_i32_0 : i32
    scf.if %2 {
      %c0_7 = arith.constant 0 : index
      %c0_8 = arith.constant 0 : index
      %12 = vector.load %arg5[%c0_7, %c0_8] : memref<1x128xf32, #tpu.memory_space<vmem>>, vector<1x128xf32>
      %13 = vector.shape_cast %12 : vector<1x128xf32> to vector<1x128xf32>
      %14 = vector.broadcast %13 : vector<1x128xf32> to vector<8x128xf32>
      %c0_9 = arith.constant 0 : index
      %c0_10 = arith.constant 0 : index
      %15 = vector.load %arg6[%c0_9, %c0_10] : memref<8x128xf32, #tpu.memory_space<vmem>>, vector<8x128xf32>
      tpu.vector_store %arg6[%c0_9, %c0_10], %14 {strides = array<i32>} : memref<8x128xf32, #tpu.memory_space<vmem>>, vector<8x128xf32>,
    } else {
    }
    %c128_i32 = arith.constant 128 : i32
    %3 = arith.muli %arg2, %c128_i32 : i32
    %4 = tpu.assume_multiple %3, 128 : i32
    %c0 = arith.constant 0 : index
    %5 = arith.index_cast %4 : i32 to index
    %6 = vector.load %arg3[%c0, %5] : memref<8x128xbf16, #tpu.memory_space<vmem>>, vector<8x128xbf16>
    %c0_1 = arith.constant 0 : index
    %c0_2 = arith.constant 0 : index
    %7 = vector.load %arg6[%c0_1, %c0_2] : memref<8x128xf32, #tpu.memory_space<vmem>>, vector<8x128xf32>
    %c0_3 = arith.constant 0 : index
    %c0_4 = arith.constant 0 : index
    %8 = vector.load %arg4[%c0_3, %c0_4] : memref<128x128xbf16, #tpu.memory_space<vmem>>, vector<128x128xbf16>
    %cst = arith.constant dense<0.000000e+00> : vector<8x128xf32>
    %9 = tpu.matmul %6, %8, %cst {dimension_numbers = #tpu.dot_dimension_numbers<[1], [0], [0], [1], [0, 0, 1, 1], [], []>} : vector<8x128xbf16>, vector<128x128xbf16>, vector<8x128xf32> -> vector<8x128xf32>
    %10 = arith.addf %7, %9 : vector<8x128xf32>
    %c0_5 = arith.constant 0 : index
    %c0_6 = arith.constant 0 : index
    %11 = vector.load %arg6[%c0_5, %c0_6] : memref<8x128xf32, #tpu.memory_space<vmem>>, vector<8x128xf32>
    tpu.vector_store %arg6[%c0_5, %c0_6], %10 {strides = array<i32>} : memref<8x128xf32, #tpu.memory_space<vmem>>, vector<8x128xf32>,
    return
  }
  func.func @transform_0(%arg0: i32, %arg1: i32, %arg2: i32) -> (i32, i32) {
    %c0_i32 = arith.constant 0 : i32
    %c0_i32_0 = arith.constant 0 : i32
    return %arg0, %c0_i32 : i32, i32
  }
  func.func @transform_1(%arg0: i32, %arg1: i32, %arg2: i32) -> (i32, i32) {
    %c0_i32 = arith.constant 0 : i32
    return %arg2, %arg1 : i32, i32
  }
  func.func @transform_2(%arg0: i32, %arg1: i32, %arg2: i32) -> (i32, i32) {
    %c0_i32 = arith.constant 0 : i32
    %c0_i32_0 = arith.constant 0 : i32
    return %c0_i32, %arg1 : i32, i32
  }
  func.func @transform_3(%arg0: i32, %arg1: i32, %arg2: i32) -> (i32, i32) {
    %c0_i32 = arith.constant 0 : i32
    return %arg0, %arg1 : i32, i32
  }
}

</mosaic_0001>

<bundles_post_ra>
// kernel: forward.1
= control target key start
LH: loop header
LB: loop body
LE: loop exit
PB: predicated region body
PF: predicated region fallthrough
CT: control target
= control target key end

     0   :  { %8 = vsyncpa [#allocation3], 0  ;;  %s891_s0 = inlined_call_operand.vmem [shape: bf16[16,128], index: 0, kind: input, shape index: {}]   ;;  %s892_s1 = inlined_call_operand.hbm [shape: bf16[128,128], index: 1, kind: input, shape index: {}]   ;;  %s893_s2 = inlined_call_operand.vmem [shape: f32[1,128], index: 2, kind: input, shape index: {}]   ;;  %s894_s3 = inlined_call_operand.hbm [shape: f32[16,128], index: 3, kind: output, shape index: {}]  }
   0x1   :  { %9 = vsyncpa [#allocation4], 0 }
   0x2   :  { %11 = vsyncpa [#allocation4 + $0x1], 0  ;;  %s738_s12 = smov 0   ;;  %s740_s13 = smov 0  }
   0x3   :  { %s742_s14 = smov 0   ;;  %s744_s15 = smov 0  }
   0x4   :  { %s746_s16 = smov 0   ;;  %s748_s17 = smov 0  }
   0x5 LB: > { %s470_s18 = sadd.s32 4294967295, %s710_s17   ;;  %s471_s19 = sadd.s32 4294967294, %s710_s17   ;;  %s710_s17 = sphi %s748_s17, %s17_s17   ;;  %s706_s16 = sphi %s746_s16, %s912_s16   ;;  %s702_s15 = sphi %s744_s15, %s911_s15   ;;  %s698_s14 = sphi %s742_s14, %s910_s14   ;;  %s694_s13 = sphi %s740_s13, %s909_s13   ;;  %s690_s12 = sphi %s738_s12, %s908_s12  }
   0x6   : > { %s36_s20 = sadd.s32 1, %s706_s16  ;;  %s125_s21 = sadd.s32 1, %s698_s14 }
   0x7   : > { %p38_p0 = scmp.ge.s32.totalorder %s36_s20, 2  ;;  %p135_p1 = scmp.ne.s32.totalorder %s698_s14, %s694_s13 }
   0x8   : > { %p136_p2 = scmp.eq.s32.totalorder %s470_s18, 1  ;;  %p141_p3 = scmp.ne.s32.totalorder %s694_s13, %s690_s12 }
   0x9   : > { %s914_s20 = smov (%p38_p0, %s36_s20), 0  ;;  %p142_p5 = scmp.eq.s32.totalorder %s471_s19, 1 }
   0xa   : > { %p778_p4 = por %p136_p2, %p135_p1  ;;  %s120_s23 = ssub.s32 %s706_s16, %s914_s20 }
   0xb   : > { %p472_p6 = scmp.ge.s32.totalorder %s710_s17, 1  ;;  %p123_p7 = scmp.eq.s32.totalorder %s120_s23, 0 }
   0xc   : > { %s899_s22 = scalar_select %p778_p4, 1, 0 }
   0xd   : > { %p785_p8 = por %p142_p5, %p141_p3  ;;  %p149_p9 = scmp.lt.s32.totalorder %s710_s17, 3 }
   0xe   : > { %s791_s25 = scalar_select %p123_p7, %s698_s14, %s125_s21  }
   0xf   : > { %s900_s24 = scalar_select %p785_p8, 1, 0 }
  0x10   : > { %p793_p10 = pnand %p472_p6, %p149_p9  ;;  %p797_p11 = scmp.eq.s32.totalorder %s470_s18, 0 }
  0x11   : > { %s712_s28 = smov [#allocation2]   ;;  %s600_s6 = scalar_lea.hbm %s892_s1, 1024 }
  0x12   : > { %s901_s26 = scalar_select %p793_p10, 1, 0 }
  0x13   : > { %s902_s27 = scalar_select %p797_p11, 1, 0 }
  0x14   : > { %p528_p12 = pneg %p793_p10  ;;  %s165_s29 = sshll.u32 %s712_s28, 4  ;;  %s166_s29 = int_to_ptr.vmem [resolvable:$true] %s165_s29 }
  0x15   : > { %p601_p0 = scmp.ne.s32.totalorder %s892_s1, %s600_s6  ;;  %p607_p5 = scmp.lt.u32.totalorder %s600_s6, %s892_s1 }
  0x16   : > { %p805_p13 = pnand %p797_p11, %p528_p12 }
  0x18   : > { %p602_p1 = pneg %p805_p13 }
  0x1a   : > { %p603_p2 = pnand %p602_p1, %p601_p0 }
  0x1c   : > { %p604_p3 = pneg %p603_p2 }
  0x1e   : > { %p609_p6 = pnand %p607_p5, %p604_p3 }
  0x20   : > { %612 = shalt.err (!%p609_p6)
}
  0x21   : > { %s613_s11 = scalar_lea.vmem %s166_s29, 1024  ;;  %p621_p8 = scmp.lt.s32.totalorder %s166_s29, %s166_s29 }
  0x22   : > { %p614_p7 = scmp.ne.s32.totalorder %s166_s29, %s613_s11  ;;  %p622_p4 = scmp.lt.s32.totalorder %s613_s11, %s613_s11 }
  0x24   : > { %p616_p9 = pnand %p614_p7, %p602_p1  ;;  %p623_p11 = por %p622_p4, %p621_p8 }
  0x26   : > { %p617_p12 = pneg %p616_p9 }
  0x28   : > { %p624_p10 = pnand %p623_p11, %p617_p12 }
  0x2a   : > { %627 = shalt.err (!%p624_p10)
}
  0x2b   : > { %s713_s18 = smov 64   ;;  %s714_s19 = smov 4  }
  0x2c   : > { %531 = dma.hbm_to_vmem [thread:$0]  (!%p805_p13), %s892_s1, 1024, %s166_s29, [#allocation3], %s713_s18, %s713_s18, %s714_s19  }
  0x2d   : > { %p904_p0 = scmp.ne.s32.totalorder %s901_s26, 0 }
  0x2e   : > { %p905_p2 = scmp.ne.s32.totalorder (!%p904_p0), %s902_s27, 0 }
  0x2f   : > { %194 = sbr.rel (%p904_p0) target bundleno = 316 (0x13c), region = 32 }
  0x36   : > { %681 = dma.done.wait (%p905_p2), [#allocation3], 1024  }
  0x37   : > { %683 = vsyncadd (%p905_p2), [#allocation3], 4294966272  ;;  %v715_v0 = vmov 0.0   ;;  %vm716_vm0 = vmmov 0   ;;  %v592_v1 = vld [vmem:[#allocation2] sm:$0xff]   ;;  %v593_v2 = vld [vmem:[#allocation2 + $0x8] sm:$0xff]  }
  0x38   : > { %502 = vmatprep.subr.bf16.mxu0 %v715_v0  ;;  %518 = vmatprep.mubr.msk.bf16.mxu0 %vm716_vm0, %v715_v0  ;;  %v594_v3 = vld [vmem:[#allocation2 + $0x10] sm:$0xff]   ;;  %v595_v4 = vld [vmem:[#allocation2 + $0x18] sm:$0xff]   ;;  %v596_v5 = vld [vmem:[#allocation2 + $0x20] sm:$0xff]   ;;  %p220_p4 = scmp.lt.s32.totalorder %s702_s15, 1  ;;  %s217_s4 = sand.u32 1, %s694_s13  }
  0x39   : > { %503 = vmatpush3.bf16.msra.mxu0 %v592_v1  ;;  %v597_v6 = vld [vmem:[#allocation2 + $0x28] sm:$0xff]   ;;  %v598_v7 = vld [vmem:[#allocation2 + $0x30] sm:$0xff]   ;;  %v599_v8 = vld [vmem:[#allocation2 + $0x38] sm:$0xff]   ;;  %s478_s5 = sshll.u32 %s217_s4, 3  ;;  %s490_s8 = sshll.u32 %s702_s15, 7 }
  0x3a   : > { %504 = vmatprep.subr.bf16.mxu0 %v715_v0  ;;  %s221_s26 = scalar_select %p220_p4, %s702_s15, 1  ;;  %v480_v10 = vld [vmem:[%s893_s2] ss:$0 sm:$0xff] }
  0x3b   : > { %s219_s9 = scalar_lea.vmem [#allocation5], %s478_s5  ;;  %s844_s19 = scalar_lea.hbm %s894_s3, %s490_s8 }
  0x3c   : > { %s479_s27 = sshll.u32 %s221_s26, 2  ;;  %s369_s10 = sshll.u32 %s219_s9, 4  ;;  %s846_s10 = int_to_ptr.vmem [resolvable:$true] %s369_s10 }
  0x3d   : > { %505 = vmatpush3.bf16.msra.mxu0 %v593_v2  ;;  %s223_s30 = scalar_lea.vmem %s891_s0, %s479_s27  ;;  %s355_s21 = scalar_lea.sflag [#allocation4], %s217_s4 }
  0x3e   : > { %506 = vmatprep.subr.bf16.mxu0 %v715_v0  ;;  %v246_v9 = vld [vmem:[%s223_s30] sm:$0xf]  ;;  %s628_s15 = scalar_lea.vmem %s846_s10, 128  ;;  %p906_p10 = scmp.ne.s32.totalorder %s899_s22, 0 }
  0x3f   : > { %p629_p8 = scmp.ne.s32.totalorder %s846_s10, %s628_s15  ;;  %s717_s23 = smov [#allocation5]  }
  0x40   : > { %s632_s26 = sshll.u32 %s717_s23, 4  ;;  %s633_s26 = int_to_ptr.vmem [resolvable:$false] %s632_s26 }
  0x41   : > { %507 = vmatpush3.bf16.msra.mxu0 %v594_v3  ;;  %p630_p11 = pnand %p629_p8, %p906_p10  ;;  %s634_s27 = scalar_lea.vmem %s633_s26, 256 }
  0x42   : > { %508 = vmatprep.subr.bf16.mxu0 %v715_v0  ;;  %p635_p1 = scmp.lt.s32.totalorder %s846_s10, %s633_s26  ;;  %p636_p3 = scmp.lt.s32.totalorder %s634_s27, %s628_s15 }
  0x43   : > { %p631_p13 = pneg %p630_p11 }
  0x44   : > { %p637_p5 = por %p636_p3, %p635_p1 }
  0x45   : > { %509 = vmatpush3.bf16.msra.mxu0 %v595_v4 }
  0x46   : > { %510 = vmatprep.subr.bf16.mxu0 %v715_v0  ;;  %p638_p6 = pnand %p637_p5, %p631_p13 }
  0x49   : > { %511 = vmatpush3.bf16.msra.mxu0 %v596_v5 }
  0x4a   : > { %512 = vmatprep.subr.bf16.mxu0 %v715_v0 }
  0x4d   : > { %513 = vmatpush3.bf16.msra.mxu0 %v597_v6 }
  0x4e   : > { %514 = vmatprep.subr.bf16.mxu0 %v715_v0 }
  0x51   : > { %515 = vmatpush3.bf16.msra.mxu0 %v598_v7 }
  0x52   : > { %516 = vmatprep.subr.bf16.mxu0 %v715_v0 }
  0x55   : > { %517 = vmatpush3.bf16.msra.mxu0 %v599_v8 }
  0x58   : > { %519 = vmatmul.mubr.bf16.vlgmr.msra.gmra.mrb[0].mxu0 %v246_v9 }
 0x12b   : > { %v346_v11 = vpop.f32.mrb[0].mxu0 }
 0x12c   : > { %v352_v12 = vadd.f32 %v480_v10, %v346_v11  ;;  %v520_v13 = vpop.f32.mrb[1].mxu0 }
 0x12d   : > { %v349_v14 = vpop.f32.mrb[2].mxu0 }
 0x12e   : > { %353 = vst [vmem:[%s219_s9] sm:$0xff] %v352_v12  ;;  %v521_v15 = vpop.f32.mrb[3].mxu0 }
 0x12f   : > { %641 = shalt.err (!%p638_p6)
}
 0x130   : > { %s642_s28 = scalar_lea.hbm %s844_s19, 128  ;;  %s646_s4 = scalar_lea.hbm %s894_s3, 256 }
 0x131   : > { %p643_p7 = scmp.ne.s32.totalorder %s844_s19, %s642_s28  ;;  %p647_p0 = scmp.lt.u32.totalorder %s844_s19, %s894_s3 }
 0x132   : > { %p648_p2 = scmp.lt.u32.totalorder %s646_s4, %s642_s28  ;;  %p650_p8 = scmp.lt.u32.totalorder %s642_s28, %s844_s19 }
 0x133   : > { %p644_p9 = pnand %p643_p7, %p906_p10 }
 0x134   : > { %p649_p4 = por %p648_p2, %p647_p0 }
 0x135   : > { %p645_p12 = pneg %p644_p9 }
 0x136   : > { %p651_p11 = por %p650_p8, %p649_p4 }
 0x138   : > { %p652_p13 = pnand %p651_p11, %p645_p12 }
 0x13a   : > { %655 = shalt.err (!%p652_p13)
}
 0x13b   : > { %526 = dma.vmem_to_hbm [thread:$0]  (%p906_p10), %s846_s10, 128, %s844_s19, %s355_s21  }
 0x13c PF: > { %p538_p1 = scmp.ge.s32.totalorder %s710_s17, 2  ;;  %s381_s7 = sand.u32 1, %s690_s12  }
 0x13d   : > { %p907_p3 = scmp.ne.s32.totalorder %s900_s24, 0  ;;  %s382_s8 = scalar_lea.sflag [#allocation4], %s381_s7 }
 0x13f   : > { %p533_p5 = pnand %p538_p1, %p907_p3 }
 0x141   : > { %685 = dma.done.wait (!%p533_p5), %s382_s8, 128  }
 0x142   : > { %687 = vsyncadd (!%p533_p5), %s382_s8, 4294967168  ;;  %s17_s17 = sadd.s32 1, %s710_s17   ;;  %s908_s12 = smov %s694_s13 }
 0x143   : > { %p14_p6 = scmp.ge.s32.totalorder %s17_s17, 4   ;;  %s909_s13 = smov %s698_s14 }
 0x144   : > { %s910_s14 = smov %s791_s25  ;;  %s911_s15 = smov %s706_s16 }
 0x145   : > { %s912_s16 = smov %s914_s20  ;;  %16 = sbr.rel (!%p14_p6) target bundleno = 5 (0x5), region = 81 }
 0x14c   :  { %387 = vsyncpa [#allocation3], 1 }
 0x14d   :  { %389 = vsyncpa [#allocation3 + $0x1], 1 }
 0x14e   :  { %390 = vsyncpa [#allocation4], 1 }
 0x14f   :  { %392 = vsyncpa [#allocation4 + $0x1], 1 }

</bundles_post_ra>
